<compile_context>
chip_gen: v7x
topology: tpu7x:2x2x1
jax: 0.10.0
libtpu: 0.0.40
codegen_flags: <defaults>
</compile_context>

<pallas_src>
import math
import functools

import numpy as np
import jax
import jax.numpy as jnp
from jax import lax
from jax.experimental import pallas as pl
from jax.experimental.pallas import tpu as pltpu


def _round_up(x, m):
    return ((x + m - 1) // m) * m


# ------------------------------ kernel A: fused (img_proj∘{k,v}) + MHA + LayerNorm ------------------------------
# grid = (B, nL).  For every batch element b, iterate over L-tiles of the image
# conditioning sequence with an online-softmax accumulator.  Per tile:
#   x      = normalize(img_cond[b, tile])                       (tL, C)
#   kvT    = Wkv^T @ x^T + b_kv     -> (2D, tL)   (single fused projection, head-major)
#   kT,vT  = split(kvT) -> (H, hd, tL)
#   s      = q (H,K,hd) . kT -> (H,K,tL); online softmax; acc += p . vT
# Finalize (last tile): per-head out-proj + sum over heads, residual add of t_norm,
# LayerNorm -> out[b] (K, D).

def _attn_kernel(img_ref, q_ref, tnorm_ref,
                 wkvT_ref, bkv_ref,
                 wo3_ref, bo_ref, gamma_ref, beta_ref,
                 out_ref, m_sc, l_sc, acc_sc, *, l_valid, need_mask):
    kv_i = pl.program_id(1)
    nkv = pl.num_programs(1)
    H, K, hd = q_ref.shape
    tl = img_ref.shape[1]
    D = H * hd

    @pl.when(kv_i == 0)
    def _init():
        m_sc[...] = jnp.full(m_sc.shape, -jnp.inf, jnp.float32)
        l_sc[...] = jnp.zeros(l_sc.shape, jnp.float32)
        acc_sc[...] = jnp.zeros(acc_sc.shape, jnp.float32)

    # --- visual path for this tile: row-normalize, one fused k/v projection (channel-major) ---
    x = img_ref[0].astype(jnp.float32)                                        # (tL, C)
    inv_n = lax.rsqrt(jnp.maximum(jnp.sum(x * x, axis=-1, keepdims=True), 1e-24))
    x = (x * inv_n).astype(jnp.bfloat16)                                      # F.normalize(dim=-1)
    # k^T and v^T in one NT matmul contracting C; bias broadcast over lanes.
    kvT = lax.dot_general(wkvT_ref[...], x, (((1,), (1,)), ((), ())),
                          preferred_element_type=jnp.float32) + bkv_ref[...]  # (2D, tL)
    kT = kvT[:D].astype(jnp.bfloat16).reshape(H, hd, tl)                      # sublane-aligned split
    vT = kvT[D:].astype(jnp.bfloat16).reshape(H, hd, tl)

    # --- head-batched scores: (H,K,hd) x (H,hd,tL) -> (H,K,tL); q pre-scaled by 1/sqrt(hd)
    s = lax.dot_general(q_ref[...], kT, (((2,), (1,)), ((0,), (0,))),
                        preferred_element_type=jnp.float32)
    if need_mask:  # only the last tile can contain padded image positions
        col = kv_i * tl + lax.broadcasted_iota(jnp.int32, s.shape, 2)
        s = jnp.where(col < l_valid, s, -1e30)

    # --- online softmax update ---
    m_prev = m_sc[...]
    m_new = jnp.maximum(m_prev, jnp.max(s, axis=-1, keepdims=True))           # (H,K,1)
    alpha = jnp.exp(m_prev - m_new)
    p = jnp.exp(s - m_new)
    l_sc[...] = alpha * l_sc[...] + jnp.sum(p, axis=-1, keepdims=True)
    pv = lax.dot_general(p.astype(jnp.bfloat16), vT, (((2,), (2,)), ((0,), (0,))),
                         preferred_element_type=jnp.float32)                  # (H,K,hd)
    acc_sc[...] = alpha * acc_sc[...] + pv
    m_sc[...] = m_new

    @pl.when(kv_i == nkv - 1)
    def _finalize():
        attn = acc_sc[...] * pl.reciprocal(l_sc[...], approx=True)            # (H,K,hd)
        # per-head output projection, summed over heads == concat(heads) @ Wo
        o = lax.dot_general(attn.astype(jnp.bfloat16), wo3_ref[...],
                            (((2,), (1,)), ((0,), (0,))),
                            preferred_element_type=jnp.float32)               # (H,K,D)
        o = jnp.sum(o, axis=0) + bo_ref[...]                                  # (K,D)
        y = tnorm_ref[...] + o                                                # dropout_1 = identity (eval)
        mu = jnp.mean(y, axis=-1, keepdims=True)
        var = jnp.mean((y - mu) ** 2, axis=-1, keepdims=True)
        yn = (y - mu) * lax.rsqrt(var + 1e-5)
        out_ref[0, :, :] = (yn * gamma_ref[...] + beta_ref[...]).astype(out_ref.dtype)


def img2text_attention(t_embs, img_cond, p, *, tl=512):
    B, L, C = img_cond.shape
    K, T, D = t_embs.shape
    H = int(p["num_heads"])
    hd = D // H
    assert H * hd == D and D % 8 == 0

    # --- hoisted, batch-invariant text path (tiny; done once, in XLA) ---
    t_mean = jnp.mean(t_embs.astype(jnp.float32), axis=1)                     # (K, D)
    t_norm = t_mean / jnp.maximum(jnp.linalg.norm(t_mean, axis=-1, keepdims=True), 1e-12)
    q = (t_norm @ p["wq"] + p["bq"]) * (1.0 / math.sqrt(hd))                  # (K, D)
    q_h = jnp.transpose(q.reshape(K, H, hd), (1, 0, 2)).astype(jnp.bfloat16)  # (H, K, hd)

    # --- img_proj folded into k/v projections (img_proj has no bias, so this is exact):
    #       k = normalize(x) @ (W_proj @ Wk) + bk,   v = normalize(x) @ (W_proj @ Wv) + bv
    #     stacked into one (2D, C) transposed matrix -> one MXU dispatch per L-tile. ---
    wpk = p["w_proj"].astype(jnp.float32) @ p["wk"].astype(jnp.float32)       # (C, D)
    wpv = p["w_proj"].astype(jnp.float32) @ p["wv"].astype(jnp.float32)       # (C, D)
    wkvT = jnp.concatenate([wpk.T, wpv.T], axis=0).astype(jnp.bfloat16)       # (2D, C)
    bkv = jnp.concatenate([p["bk"].reshape(D), p["bv"].reshape(D)]
                          ).reshape(2 * D, 1).astype(jnp.float32)             # (2D, 1)
    wo3 = p["wo"].reshape(H, hd, D).astype(jnp.bfloat16)                      # (H, hd, D)
    bo = p["bo"].reshape(1, D).astype(jnp.float32)
    gamma = p["ln_gamma"].reshape(1, D).astype(jnp.float32)
    beta = p["ln_beta"].reshape(1, D).astype(jnp.float32)

    # --- L tiling (pad to multiple of tL, mask padded key positions in-kernel) ---
    tl = _round_up(max(8, min(int(tl), _round_up(L, 8))), 8)
    Lp = _round_up(L, tl)
    img_pad = img_cond if Lp == L else jnp.pad(img_cond, ((0, 0), (0, Lp - L), (0, 0)))
    nL = Lp // tl
    # TODO(synk): on v5e, pipeline_mode=pl.Buffered(3) on the image tile spec hides DMA latency further.

    kernel = functools.partial(_attn_kernel, l_valid=L, need_mask=(Lp != L))
    full = lambda shape: pl.BlockSpec(shape, lambda b, k, _s=len(shape): (0,) * _s)

    return pl.pallas_call(
        kernel,
        out_shape=jax.ShapeDtypeStruct((B, K, D), jnp.float32),
        grid=(B, nL),
        in_specs=[
            pl.BlockSpec((1, tl, C), lambda b, k: (b, k, 0)),   # image tile
            full((H, K, hd)),                                   # q (pre-scaled, per head)
            full((K, D)),                                       # t_norm (residual)
            full((2 * D, C)), full((2 * D, 1)),                 # fused [Wk|Wv]^T (with img_proj), bias
            full((H, hd, D)), full((1, D)),                     # Wo (per head), bo
            full((1, D)), full((1, D)),                         # ln gamma, beta
        ],
        out_specs=pl.BlockSpec((1, K, D), lambda b, k: (b, 0, 0)),
        scratch_shapes=[pltpu.VMEM((H, K, 1), jnp.float32),     # m
                        pltpu.VMEM((H, K, 1), jnp.float32),     # l
                        pltpu.VMEM((H, K, hd), jnp.float32)],   # acc
        compiler_params=pltpu.CompilerParams(
            dimension_semantics=("parallel", "arbitrary")),
    )(img_pad, q_h, t_norm, wkvT, bkv, wo3, bo, gamma, beta)


# ------------------------------ kernel B: per-image correlations ------------------------------
# grid = (B,), one disjoint (R, K) output row-block per batch element ("parallel").
#   out[b] = scale * normalize(m_rows_of_b) @ t_out[b].T + resid_rows_of_b

def _corr_kernel(m_ref, t_ref, resid_ref, scale_ref, out_ref):
    m = m_ref[0].astype(jnp.float32)                                          # (R, D)
    inv_n = lax.rsqrt(jnp.maximum(jnp.sum(m * m, axis=-1, keepdims=True), 1e-24))
    m = m * inv_n                                                             # padded zero rows stay 0
    t = t_ref[0]                                                              # (K, D), f32
    # final logits kept in f32 (small fraction of total FLOPs; preserves output accuracy)
    s = lax.dot_general(m, t, (((1,), (1,)), ((), ())),
                        preferred_element_type=jnp.float32)                   # (R, K)
    out_ref[0, :, :] = s * scale_ref[0] + resid_ref[0]


def correlations(m_embs, t_out, mask2batch, corrs, p):
    Q, D = m_embs.shape
    B, K, _ = t_out.shape
    T = corrs.shape[-1]

    # --- fold corrs_out(corrs_in(.)) into one (T,) vector + scalar, applied as a single XLA matvec;
    #     the (Q,K,T) tensor is read exactly once and never enters VMEM. ---
    weff = (p["corr_w2"] @ p["corr_w1"]).reshape(T)                           # (1,Cw)@(Cw,T) -> (T,)
    beff = jnp.sum(p["corr_b1"] * p["corr_w2"].reshape(-1)) + p["corr_b2"].reshape(())
    resid = jnp.einsum("qkt,t->qk", corrs.astype(jnp.float32), weff) + beff   # (Q, K)

    scale = jnp.minimum(jnp.exp(p["logit_scale"]), 100.0).reshape(1).astype(jnp.float32)

    # --- per-batch padded row layout (block-aligned alternative to offset-based scalar prefetch):
    #     each batch gets a fixed R-row slot, so every grid step writes a disjoint block. ---
    m2b = np.asarray(jax.device_get(mask2batch)).astype(np.int64)
    if m2b.size > 1 and not np.all(np.diff(m2b) >= 0):
        raise ValueError("mask2batch must be sorted by batch id (documented assumption)")
    counts = np.bincount(m2b, minlength=B)
    offsets = np.concatenate([[0], np.cumsum(counts)[:-1]])
    R = int(max(8, _round_up(int(counts.max()) if counts.size else 1, 8)))
    dest = jnp.asarray((m2b * R + (np.arange(Q) - offsets[m2b])).astype(np.int32))

    m_pad = jnp.zeros((B * R, D), m_embs.dtype).at[dest].set(m_embs).reshape(B, R, D)
    resid_pad = jnp.zeros((B * R, K), jnp.float32).at[dest].set(resid).reshape(B, R, K)

    out_pad = pl.pallas_call(
        _corr_kernel,
        out_shape=jax.ShapeDtypeStruct((B, R, K), jnp.float32),
        grid=(B,),
        in_specs=[
            pl.BlockSpec((1, R, D), lambda b: (b, 0, 0)),                     # m rows of batch b
            pl.BlockSpec((1, K, D), lambda b: (b, 0, 0)),                     # t_out[b]
            pl.BlockSpec((1, R, K), lambda b: (b, 0, 0)),                     # residual rows of batch b
            pl.BlockSpec(memory_space=pltpu.MemorySpace.SMEM),                # logit scale
        ],
        out_specs=pl.BlockSpec((1, R, K), lambda b: (b, 0, 0)),
        compiler_params=pltpu.CompilerParams(dimension_semantics=("parallel",)),
    )(m_pad, t_out, resid_pad, scale)

    return out_pad.reshape(B * R, K)[dest]                                    # back to original row order


# ------------------------------ forward wrapper ------------------------------

def pseudo_text_psm_forward(corrs, masks, mask2batch, features, params, *, attn_l_tile=512):
    del masks  # unused by the reference forward
    # glue: NCHW -> (B, L, C), concat feature keys along the sequence axis
    # TODO(synk): could keep features channel-major and feed (C, L) tiles directly to skip this
    # extra XLA transpose pass (v5e HBM-BW item).
    img_list = []
    for key in params["img_cond_keys"]:
        f = features[key]                                   # (B, C, H, W)
        B, C, H, W = f.shape
        img_list.append(jnp.transpose(f.reshape(B, C, H * W), (0, 2, 1)))
    img_cond = jnp.concatenate(img_list, axis=1)            # (B, L, C)

    t_out = img2text_attention(features["t_embs"], img_cond, params, tl=attn_l_tile)  # (B, K, D)
    m_embs = jnp.concatenate(features["m_embs"], axis=0)                              # (Q, D)
    return correlations(m_embs, t_out, mask2batch, corrs, params)                     # (Q, K)


# ------------------------------ pure-JAX f32 reference (mirrors the torch code) ------------------------------

def reference_forward(corrs, mask2batch, features, p):
    img_list = []
    for key in p["img_cond_keys"]:
        f = features[key]
        B, C, H, W = f.shape
        img_list.append(jnp.transpose(f.reshape(B, C, H * W), (0, 2, 1)))
    img_cond = jnp.concatenate(img_list, axis=1)
    img_cond = img_cond / jnp.maximum(
        jnp.linalg.norm(img_cond, axis=-1, keepdims=True), 1e-12)
    img = img_cond @ p["w_proj"]

    t = features["t_embs"].mean(axis=1)
    t = t / jnp.maximum(jnp.linalg.norm(t, axis=-1, keepdims=True), 1e-12)
    Bsz = img.shape[0]
    K, D = t.shape
    tB = jnp.broadcast_to(t[None], (Bsz, K, D))

    H = p["num_heads"]
    hd = D // H
    q = tB @ p["wq"] + p["bq"][0]
    k = img @ p["wk"] + p["bk"][0]
    v = img @ p["wv"] + p["bv"][0]
    split = lambda x: x.reshape(x.shape[0], x.shape[1], H, hd).transpose(0, 2, 1, 3)
    qh, kh, vh = split(q), split(k), split(v)
    s = jnp.einsum("bhqd,bhkd->bhqk", qh, kh) / math.sqrt(hd)
    pattn = jax.nn.softmax(s, axis=-1)
    o = jnp.einsum("bhqk,bhkd->bhqd", pattn, vh).transpose(0, 2, 1, 3).reshape(Bsz, K, D)
    o = o @ p["wo"] + p["bo"][0]
    y = tB + o
    mu = y.mean(-1, keepdims=True)
    var = ((y - mu) ** 2).mean(-1, keepdims=True)
    y = (y - mu) / jnp.sqrt(var + 1e-5) * p["ln_gamma"][0] + p["ln_beta"][0]

    m = jnp.concatenate(features["m_embs"], axis=0)
    m = m / jnp.maximum(jnp.linalg.norm(m, axis=-1, keepdims=True), 1e-12)
    m2b = np.asarray(mask2batch)
    outs = []
    for bid in np.unique(m2b):
        sel = m[m2b == bid]
        outs.append(jnp.einsum("qd,kd->qk", sel, y[int(bid)]))
    out = jnp.concatenate(outs, axis=0)
    out = out * jnp.minimum(jnp.exp(p["logit_scale"]), 100.0)
    h1 = corrs @ p["corr_w1"].T + p["corr_b1"]
    r = (h1 @ p["corr_w2"].T + p["corr_b2"]).squeeze(-1)
    return out + r


# ------------------------------ main ------------------------------

if __name__ == "__main__":
    # small shapes
    B, C_IMG, D, NHEADS = 2, 24, 32, 4                    # head_dim = 8 (multiple of 8)
    K_CLS, T_TMPL, CW = 8, 5, 16

    key = jax.random.PRNGKey(0)
    ks = jax.random.split(key, 24)
    rnd = lambda k, shape, s=0.05: (s * jax.random.normal(k, shape)).astype(jnp.float32)

    params = dict(
        img_cond_keys=["res4", "res5"],
        num_heads=NHEADS,
        w_proj=rnd(ks[0], (C_IMG, D)),                    # img_proj (x @ W, no bias)
        wq=rnd(ks[1], (D, D)), bq=rnd(ks[2], (1, D)),
        wk=rnd(ks[3], (D, D)), bk=rnd(ks[4], (1, D)),
        wv=rnd(ks[5], (D, D)), bv=rnd(ks[6], (1, D)),
        wo=rnd(ks[7], (D, D)), bo=rnd(ks[8], (1, D)),
        ln_gamma=jnp.ones((1, D), jnp.float32) + rnd(ks[9], (1, D), 0.01),
        ln_beta=rnd(ks[10], (1, D), 0.01),
        logit_scale=jnp.asarray(math.log(1.0 / 0.07), jnp.float32),
        corr_w1=rnd(ks[11], (CW, T_TMPL)),                # corrs_in.weight  (PyTorch layout)
        corr_b1=rnd(ks[12], (CW,)),
        corr_w2=rnd(ks[13], (1, CW)),                     # corrs_out.weight
        corr_b2=rnd(ks[14], (1,)),
    )

    features = dict(
        res4=rnd(ks[15], (B, C_IMG, 4, 4), 1.0),          # L contribution: 16
        res5=rnd(ks[16], (B, C_IMG, 2, 2), 1.0),          # L contribution: 4  -> L = 20
        t_embs=rnd(ks[17], (K_CLS, T_TMPL, D), 1.0),
        m_embs=[rnd(ks[18], (2, D), 1.0),                 # 2 masks for image 0
                rnd(ks[19], (4, D), 1.0)],                # 4 masks for image 1
    )
    Q = 2 + 4
    corrs = rnd(ks[20], (Q, K_CLS, T_TMPL), 1.0)
    masks = rnd(ks[21], (Q, 8, 8), 1.0)                   # unused by forward
    mask2batch = jnp.asarray([0, 0, 1, 1, 1, 1], jnp.int32)

    # attn_l_tile=8 forces 3 L-tiles (Lp=24 > L=20) so the online-softmax + masking path is exercised.
    out = pseudo_text_psm_forward(corrs, masks, mask2batch, features, params, attn_l_tile=8)
    out = jax.block_until_ready(out)
    assert out.shape == (Q, K_CLS), out.shape

    ref = reference_forward(corrs, mask2batch, features, params)
    err = float(jnp.max(jnp.abs(out - ref)))
    denom = max(1.0, float(jnp.max(jnp.abs(ref))))
    # bf16 MXU inputs + approx softmax reciprocal -> check against 1% of the output dynamic range
    assert err / denom < 1e-2, f"relative error {err / denom:.3e} (abs {err:.3e})"
    print("KERNEL_OK")
</pallas_src>

<mosaic_0001>
module attributes {stable_mosaic.version = 11 : i64} {
  func.func @_attn_kernel(%arg0: i32, %arg1: i32, %arg2: memref<1x8x24xf32, #tpu.memory_space<vmem>>, %arg3: memref<4x8x8xbf16, #tpu.memory_space<vmem>>, %arg4: memref<8x32xf32, #tpu.memory_space<vmem>>, %arg5: memref<64x24xbf16, #tpu.memory_space<vmem>>, %arg6: memref<64x1xf32, #tpu.memory_space<vmem>>, %arg7: memref<4x8x32xbf16, #tpu.memory_space<vmem>>, %arg8: memref<1x32xf32, #tpu.memory_space<vmem>>, %arg9: memref<1x32xf32, #tpu.memory_space<vmem>>, %arg10: memref<1x32xf32, #tpu.memory_space<vmem>>, %arg11: memref<1x8x32xf32, #tpu.memory_space<vmem>>, %arg12: memref<4x8x1xf32, #tpu.memory_space<vmem>>, %arg13: memref<4x8x1xf32, #tpu.memory_space<vmem>>, %arg14: memref<4x8x8xf32, #tpu.memory_space<vmem>>) attributes {dimension_semantics = [#tpu.dimension_semantics<parallel>, #tpu.dimension_semantics<arbitrary>], iteration_bounds = array<i64: 2, 3>, scalar_prefetch = 0 : i64, scratch_operands = 3 : i64, tpu.core_type = #tpu.core_type<tc>, window_params = [{transform_indices = @transform_0, window_bounds = array<i64: 1, 8, 24>}, {pipeline_mode = #tpu.pipeline_mode<synchronous>, transform_indices = @transform_1, window_bounds = array<i64: 4, 8, 8>}, {pipeline_mode = #tpu.pipeline_mode<synchronous>, transform_indices = @transform_2, window_bounds = array<i64: 8, 32>}, {pipeline_mode = #tpu.pipeline_mode<synchronous>, transform_indices = @transform_3, window_bounds = array<i64: 64, 24>}, {pipeline_mode = #tpu.pipeline_mode<synchronous>, transform_indices = @transform_4, window_bounds = array<i64: 64, 1>}, {pipeline_mode = #tpu.pipeline_mode<synchronous>, transform_indices = @transform_5, window_bounds = array<i64: 4, 8, 32>}, {pipeline_mode = #tpu.pipeline_mode<synchronous>, transform_indices = @transform_6, window_bounds = array<i64: 1, 32>}, {pipeline_mode = #tpu.pipeline_mode<synchronous>, transform_indices = @transform_7, window_bounds = array<i64: 1, 32>}, {pipeline_mode = #tpu.pipeline_mode<synchronous>, transform_indices = @transform_8, window_bounds = array<i64: 1, 32>}, {transform_indices = @transform_9, window_bounds = array<i64: 1, 8, 32>}]} {
    %c0_i32 = arith.constant 0 : i32
    %0 = arith.cmpi eq, %arg1, %c0_i32 : i32
    %1 = arith.extui %0 : i1 to i32
    %c0_i32_0 = arith.constant 0 : i32
    %2 = arith.cmpi ne, %1, %c0_i32_0 : i32
    scf.if %2 {
      %cst_36 = arith.constant 0xFF800000 : f32
      %61 = vector.broadcast %cst_36 : f32 to vector<4x8x1xf32>
      %c0_37 = arith.constant 0 : index
      %c0_38 = arith.constant 0 : index
      %c0_39 = arith.constant 0 : index
      %62 = vector.load %arg12[%c0_37, %c0_38, %c0_39] : memref<4x8x1xf32, #tpu.memory_space<vmem>>, vector<4x8x1xf32>
      tpu.vector_store %arg12[%c0_37, %c0_38, %c0_39], %61 {strides = array<i32>} : memref<4x8x1xf32, #tpu.memory_space<vmem>>, vector<4x8x1xf32>,
      %cst_40 = arith.constant 0.000000e+00 : f32
      %63 = vector.broadcast %cst_40 : f32 to vector<4x8x1xf32>
      %c0_41 = arith.constant 0 : index
      %c0_42 = arith.constant 0 : index
      %c0_43 = arith.constant 0 : index
      %64 = vector.load %arg13[%c0_41, %c0_42, %c0_43] : memref<4x8x1xf32, #tpu.memory_space<vmem>>, vector<4x8x1xf32>
      tpu.vector_store %arg13[%c0_41, %c0_42, %c0_43], %63 {strides = array<i32>} : memref<4x8x1xf32, #tpu.memory_space<vmem>>, vector<4x8x1xf32>,
      %cst_44 = arith.constant 0.000000e+00 : f32
      %65 = vector.broadcast %cst_44 : f32 to vector<4x8x8xf32>
      %c0_45 = arith.constant 0 : index
      %c0_46 = arith.constant 0 : index
      %c0_47 = arith.constant 0 : index
      %66 = vector.load %arg14[%c0_45, %c0_46, %c0_47] : memref<4x8x8xf32, #tpu.memory_space<vmem>>, vector<4x8x8xf32>
      tpu.vector_store %arg14[%c0_45, %c0_46, %c0_47], %65 {strides = array<i32>} : memref<4x8x8xf32, #tpu.memory_space<vmem>>, vector<4x8x8xf32>,
    } else {
    }
    %c0 = arith.constant 0 : index
    %c0_1 = arith.constant 0 : index
    %c0_2 = arith.constant 0 : index
    %3 = vector.load %arg2[%c0, %c0_1, %c0_2] : memref<1x8x24xf32, #tpu.memory_space<vmem>>, vector<1x8x24xf32>
    %4 = vector.shape_cast %3 : vector<1x8x24xf32> to vector<8x24xf32>
    %5 = arith.mulf %4, %4 : vector<8x24xf32>
    %cst = arith.constant dense<0.000000e+00> : vector<8xf32>
    %6 = vector.multi_reduction <add>, %5, %cst [1] : vector<8x24xf32> to vector<8xf32>
    %7 = vector.shape_cast %6 : vector<8xf32> to vector<8x1xf32>
    %cst_3 = arith.constant 1.000000e-24 : f32
    %8 = vector.broadcast %cst_3 : f32 to vector<8x1xf32>
    %9 = arith.maximumf %7, %8 : vector<8x1xf32>
    %10 = math.rsqrt %9 : vector<8x1xf32>
    %11 = vector.broadcast %10 : vector<8x1xf32> to vector<8x24xf32>
    %12 = arith.mulf %4, %11 : vector<8x24xf32>
    %13 = arith.truncf %12 : vector<8x24xf32> to vector<8x24xbf16>
    %c0_4 = arith.constant 0 : index
    %c0_5 = arith.constant 0 : index
    %14 = vector.load %arg5[%c0_4, %c0_5] : memref<64x24xbf16, #tpu.memory_space<vmem>>, vector<64x24xbf16>
    %cst_6 = arith.constant dense<0.000000e+00> : vector<64x8xf32>
    %15 = tpu.matmul %14, %13, %cst_6 {dimension_numbers = #tpu.dot_dimension_numbers<[1], [1], [0], [0], [0, 0, 1, 0], [], []>} : vector<64x24xbf16>, vector<8x24xbf16>, vector<64x8xf32> -> vector<64x8xf32>
    %c0_7 = arith.constant 0 : index
    %c0_8 = arith.constant 0 : index
    %16 = vector.load %arg6[%c0_7, %c0_8] : memref<64x1xf32, #tpu.memory_space<vmem>>, vector<64x1xf32>
    %17 = vector.broadcast %16 : vector<64x1xf32> to vector<64x8xf32>
    %18 = arith.addf %15, %17 : vector<64x8xf32>
    %19 = vector.extract_strided_slice %18 {offsets = [0, 0], sizes = [32, 8], strides = [1, 1]} : vector<64x8xf32> to vector<32x8xf32>
    %20 = arith.truncf %19 : vector<32x8xf32> to vector<32x8xbf16>
    %21 = vector.shape_cast %20 : vector<32x8xbf16> to vector<4x8x8xbf16>
    %22 = vector.extract_strided_slice %18 {offsets = [32, 0], sizes = [32, 8], strides = [1, 1]} : vector<64x8xf32> to vector<32x8xf32>
    %23 = arith.truncf %22 : vector<32x8xf32> to vector<32x8xbf16>
    %24 = vector.shape_cast %23 : vector<32x8xbf16> to vector<4x8x8xbf16>
    %c0_9 = arith.constant 0 : index
    %c0_10 = arith.constant 0 : index
    %c0_11 = arith.constant 0 : index
    %25 = vector.load %arg3[%c0_9, %c0_10, %c0_11] : memref<4x8x8xbf16, #tpu.memory_space<vmem>>, vector<4x8x8xbf16>
    %cst_12 = arith.constant dense<0.000000e+00> : vector<4x8x8xf32>
    %26 = tpu.matmul %25, %21, %cst_12 {dimension_numbers = #tpu.dot_dimension_numbers<[2], [1], [1], [2], [0, 0, 0, 1, 1, 2], [0], [0]>} : vector<4x8x8xbf16>, vector<4x8x8xbf16>, vector<4x8x8xf32> -> vector<4x8x8xf32>
    %c8_i32 = arith.constant 8 : i32
    %27 = arith.muli %arg1, %c8_i32 : i32
    %28 = tpu.iota {dimensions = array<i32: 2>} : vector<4x8x8xi32>
    %29 = vector.broadcast %27 : i32 to vector<4x8x8xi32>
    %30 = arith.addi %29, %28 : vector<4x8x8xi32>
    %c20_i32 = arith.constant 20 : i32
    %31 = vector.broadcast %c20_i32 : i32 to vector<4x8x8xi32>
    %32 = arith.cmpi slt, %30, %31 : vector<4x8x8xi32>
    %cst_13 = arith.constant -1.000000e+30 : f32
    %33 = vector.broadcast %cst_13 : f32 to vector<4x8x8xf32>
    %34 = arith.select %32, %26, %33 : vector<4x8x8xi1>, vector<4x8x8xf32>
    %c0_14 = arith.constant 0 : index
    %c0_15 = arith.constant 0 : index
    %c0_16 = arith.constant 0 : index
    %35 = vector.load %arg12[%c0_14, %c0_15, %c0_16] : memref<4x8x1xf32, #tpu.memory_space<vmem>>, vector<4x8x1xf32>
    %cst_17 = arith.constant dense<0xFF800000> : vector<4x8xf32>
    %36 = vector.multi_reduction <maximumf>, %34, %cst_17 [2] : vector<4x8x8xf32> to vector<4x8xf32>
    %37 = vector.shape_cast %36 : vector<4x8xf32> to vector<4x8x1xf32>
    %38 = arith.maximumf %35, %37 : vector<4x8x1xf32>
    %39 = arith.subf %35, %38 : vector<4x8x1xf32>
    %40 = math.exp %39 : vector<4x8x1xf32>
    %41 = vector.broadcast %38 : vector<4x8x1xf32> to vector<4x8x8xf32>
    %42 = arith.subf %34, %41 : vector<4x8x8xf32>
    %43 = math.exp %42 : vector<4x8x8xf32>
    %c0_18 = arith.constant 0 : index
    %c0_19 = arith.constant 0 : index
    %c0_20 = arith.constant 0 : index
    %44 = vector.load %arg13[%c0_18, %c0_19, %c0_20] : memref<4x8x1xf32, #tpu.memory_space<vmem>>, vector<4x8x1xf32>
    %45 = arith.mulf %40, %44 : vector<4x8x1xf32>
    %cst_21 = arith.constant dense<0.000000e+00> : vector<4x8xf32>
    %46 = vector.multi_reduction <add>, %43, %cst_21 [2] : vector<4x8x8xf32> to vector<4x8xf32>
    %47 = vector.shape_cast %46 : vector<4x8xf32> to vector<4x8x1xf32>
    %48 = arith.addf %45, %47 : vector<4x8x1xf32>
    %c0_22 = arith.constant 0 : index
    %c0_23 = arith.constant 0 : index
    %c0_24 = arith.constant 0 : index
    %49 = vector.load %arg13[%c0_22, %c0_23, %c0_24] : memref<4x8x1xf32, #tpu.memory_space<vmem>>, vector<4x8x1xf32>
    tpu.vector_store %arg13[%c0_22, %c0_23, %c0_24], %48 {strides = array<i32>} : memref<4x8x1xf32, #tpu.memory_space<vmem>>, vector<4x8x1xf32>,
    %50 = arith.truncf %43 : vector<4x8x8xf32> to vector<4x8x8xbf16>
    %cst_25 = arith.constant dense<0.000000e+00> : vector<4x8x8xf32>
    %51 = tpu.matmul %50, %24, %cst_25 {dimension_numbers = #tpu.dot_dimension_numbers<[2], [2], [1], [1], [0, 0, 0, 1, 1, 1], [0], [0]>} : vector<4x8x8xbf16>, vector<4x8x8xbf16>, vector<4x8x8xf32> -> vector<4x8x8xf32>
    %c0_26 = arith.constant 0 : index
    %c0_27 = arith.constant 0 : index
    %c0_28 = arith.constant 0 : index
    %52 = vector.load %arg14[%c0_26, %c0_27, %c0_28] : memref<4x8x8xf32, #tpu.memory_space<vmem>>, vector<4x8x8xf32>
    %53 = vector.broadcast %40 : vector<4x8x1xf32> to vector<4x8x8xf32>
    %54 = arith.mulf %53, %52 : vector<4x8x8xf32>
    %55 = arith.addf %54, %51 : vector<4x8x8xf32>
    %c0_29 = arith.constant 0 : index
    %c0_30 = arith.constant 0 : index
    %c0_31 = arith.constant 0 : index
    %56 = vector.load %arg14[%c0_29, %c0_30, %c0_31] : memref<4x8x8xf32, #tpu.memory_space<vmem>>, vector<4x8x8xf32>
    tpu.vector_store %arg14[%c0_29, %c0_30, %c0_31], %55 {strides = array<i32>} : memref<4x8x8xf32, #tpu.memory_space<vmem>>, vector<4x8x8xf32>,
    %c0_32 = arith.constant 0 : index
    %c0_33 = arith.constant 0 : index
    %c0_34 = arith.constant 0 : index
    %57 = vector.load %arg12[%c0_32, %c0_33, %c0_34] : memref<4x8x1xf32, #tpu.memory_space<vmem>>, vector<4x8x1xf32>
    tpu.vector_store %arg12[%c0_32, %c0_33, %c0_34], %38 {strides = array<i32>} : memref<4x8x1xf32, #tpu.memory_space<vmem>>, vector<4x8x1xf32>,
    %c2_i32 = arith.constant 2 : i32
    %58 = arith.cmpi eq, %arg1, %c2_i32 : i32
    %59 = arith.extui %58 : i1 to i32
    %c0_i32_35 = arith.constant 0 : i32
    %60 = arith.cmpi ne, %59, %c0_i32_35 : i32
    scf.if %60 {
      %c0_36 = arith.constant 0 : index
      %c0_37 = arith.constant 0 : index
      %c0_38 = arith.constant 0 : index
      %61 = vector.load %arg14[%c0_36, %c0_37, %c0_38] : memref<4x8x8xf32, #tpu.memory_space<vmem>>, vector<4x8x8xf32>
      %c0_39 = arith.constant 0 : index
      %c0_40 = arith.constant 0 : index
      %c0_41 = arith.constant 0 : index
      %62 = vector.load %arg13[%c0_39, %c0_40, %c0_41] : memref<4x8x1xf32, #tpu.memory_space<vmem>>, vector<4x8x1xf32>
      %63 = tpu.reciprocal %62 {approx = true} : vector<4x8x1xf32> -> vector<4x8x1xf32>
      %64 = vector.broadcast %63 : vector<4x8x1xf32> to vector<4x8x8xf32>
      %65 = arith.mulf %61, %64 : vector<4x8x8xf32>
      %66 = arith.truncf %65 : vector<4x8x8xf32> to vector<4x8x8xbf16>
      %c0_42 = arith.constant 0 : index
      %c0_43 = arith.constant 0 : index
      %c0_44 = arith.constant 0 : index
      %67 = vector.load %arg7[%c0_42, %c0_43, %c0_44] : memref<4x8x32xbf16, #tpu.memory_space<vmem>>, vector<4x8x32xbf16>
      %cst_45 = arith.constant dense<0.000000e+00> : vector<4x8x32xf32>
      %68 = tpu.matmul %66, %67, %cst_45 {dimension_numbers = #tpu.dot_dimension_numbers<[2], [1], [1], [2], [0, 0, 0, 1, 1, 2], [0], [0]>} : vector<4x8x8xbf16>, vector<4x8x32xbf16>, vector<4x8x32xf32> -> vector<4x8x32xf32>
      %cst_46 = arith.constant dense<0.000000e+00> : vector<8x32xf32>
      %69 = vector.multi_reduction <add>, %68, %cst_46 [0] : vector<4x8x32xf32> to vector<8x32xf32>
      %c0_47 = arith.constant 0 : index
      %c0_48 = arith.constant 0 : index
      %70 = vector.load %arg8[%c0_47, %c0_48] : memref<1x32xf32, #tpu.memory_space<vmem>>, vector<1x32xf32>
      %71 = vector.broadcast %70 : vector<1x32xf32> to vector<8x32xf32>
      %72 = arith.addf %69, %71 : vector<8x32xf32>
      %c0_49 = arith.constant 0 : index
      %c0_50 = arith.constant 0 : index
      %73 = vector.load %arg4[%c0_49, %c0_50] : memref<8x32xf32, #tpu.memory_space<vmem>>, vector<8x32xf32>
      %74 = arith.addf %73, %72 : vector<8x32xf32>
      %cst_51 = arith.constant dense<0.000000e+00> : vector<8xf32>
      %75 = vector.multi_reduction <add>, %74, %cst_51 [1] : vector<8x32xf32> to vector<8xf32>
      %76 = vector.shape_cast %75 : vector<8xf32> to vector<8x1xf32>
      %cst_52 = arith.constant 3.200000e+01 : f32
      %77 = vector.broadcast %cst_52 : f32 to vector<8x1xf32>
      %78 = arith.divf %76, %77 : vector<8x1xf32>
      %79 = vector.broadcast %78 : vector<8x1xf32> to vector<8x32xf32>
      %80 = arith.subf %74, %79 : vector<8x32xf32>
      %81 = arith.mulf %80, %80 : vector<8x32xf32>
      %cst_53 = arith.constant dense<0.000000e+00> : vector<8xf32>
      %82 = vector.multi_reduction <add>, %81, %cst_53 [1] : vector<8x32xf32> to vector<8xf32>
      %83 = vector.shape_cast %82 : vector<8xf32> to vector<8x1xf32>
      %cst_54 = arith.constant 3.200000e+01 : f32
      %84 = vector.broadcast %cst_54 : f32 to vector<8x1xf32>
      %85 = arith.divf %83, %84 : vector<8x1xf32>
      %86 = vector.broadcast %78 : vector<8x1xf32> to vector<8x32xf32>
      %87 = arith.subf %74, %86 : vector<8x32xf32>
      %cst_55 = arith.constant 9.99999974E-6 : f32
      %88 = vector.broadcast %cst_55 : f32 to vector<8x1xf32>
      %89 = arith.addf %85, %88 : vector<8x1xf32>
      %90 = math.rsqrt %89 : vector<8x1xf32>
      %91 = vector.broadcast %90 : vector<8x1xf32> to vector<8x32xf32>
      %92 = arith.mulf %87, %91 : vector<8x32xf32>
      %c0_56 = arith.constant 0 : index
      %c0_57 = arith.constant 0 : index
      %93 = vector.load %arg9[%c0_56, %c0_57] : memref<1x32xf32, #tpu.memory_space<vmem>>, vector<1x32xf32>
      %94 = vector.broadcast %93 : vector<1x32xf32> to vector<8x32xf32>
      %95 = arith.mulf %92, %94 : vector<8x32xf32>
      %c0_58 = arith.constant 0 : index
      %c0_59 = arith.constant 0 : index
      %96 = vector.load %arg10[%c0_58, %c0_59] : memref<1x32xf32, #tpu.memory_space<vmem>>, vector<1x32xf32>
      %97 = vector.broadcast %96 : vector<1x32xf32> to vector<8x32xf32>
      %98 = arith.addf %95, %97 : vector<8x32xf32>
      %c0_60 = arith.constant 0 : index
      %c0_61 = arith.constant 0 : index
      %c0_62 = arith.constant 0 : index
      %99 = vector.load %arg11[%c0_60, %c0_61, %c0_62] : memref<1x8x32xf32, #tpu.memory_space<vmem>>, vector<1x8x32xf32>
      %100 = vector.shape_cast %99 : vector<1x8x32xf32> to vector<8x32xf32>
      %101 = vector.shape_cast %98 : vector<8x32xf32> to vector<1x8x32xf32>
      tpu.vector_store %arg11[%c0_60, %c0_61, %c0_62], %101 {strides = array<i32>} : memref<1x8x32xf32, #tpu.memory_space<vmem>>, vector<1x8x32xf32>,
    } else {
    }
    return
  }
  func.func @transform_0(%arg0: i32, %arg1: i32) -> (i32, i32, i32) {
    %c0_i32 = arith.constant 0 : i32
    %c0_i32_0 = arith.constant 0 : i32
    return %arg0, %arg1, %c0_i32 : i32, i32, i32
  }
  func.func @transform_1(%arg0: i32, %arg1: i32) -> (i32, i32, i32) {
    %c0_i32 = arith.constant 0 : i32
    %c0_i32_0 = arith.constant 0 : i32
    %c0_i32_1 = arith.constant 0 : i32
    %c0_i32_2 = arith.constant 0 : i32
    return %c0_i32, %c0_i32_0, %c0_i32_1 : i32, i32, i32
  }
  func.func @transform_2(%arg0: i32, %arg1: i32) -> (i32, i32) {
    %c0_i32 = arith.constant 0 : i32
    %c0_i32_0 = arith.constant 0 : i32
    %c0_i32_1 = arith.constant 0 : i32
    return %c0_i32, %c0_i32_0 : i32, i32
  }
  func.func @transform_3(%arg0: i32, %arg1: i32) -> (i32, i32) {
    %c0_i32 = arith.constant 0 : i32
    %c0_i32_0 = arith.constant 0 : i32
    %c0_i32_1 = arith.constant 0 : i32
    return %c0_i32, %c0_i32_0 : i32, i32
  }
  func.func @transform_4(%arg0: i32, %arg1: i32) -> (i32, i32) {
    %c0_i32 = arith.constant 0 : i32
    %c0_i32_0 = arith.constant 0 : i32
    %c0_i32_1 = arith.constant 0 : i32
    return %c0_i32, %c0_i32_0 : i32, i32
  }
  func.func @transform_5(%arg0: i32, %arg1: i32) -> (i32, i32, i32) {
    %c0_i32 = arith.constant 0 : i32
    %c0_i32_0 = arith.constant 0 : i32
    %c0_i32_1 = arith.constant 0 : i32
    %c0_i32_2 = arith.constant 0 : i32
    return %c0_i32, %c0_i32_0, %c0_i32_1 : i32, i32, i32
  }
  func.func @transform_6(%arg0: i32, %arg1: i32) -> (i32, i32) {
    %c0_i32 = arith.constant 0 : i32
    %c0_i32_0 = arith.constant 0 : i32
    %c0_i32_1 = arith.constant 0 : i32
    return %c0_i32, %c0_i32_0 : i32, i32
  }
  func.func @transform_7(%arg0: i32, %arg1: i32) -> (i32, i32) {
    %c0_i32 = arith.constant 0 : i32
    %c0_i32_0 = arith.constant 0 : i32
    %c0_i32_1 = arith.constant 0 : i32
    return %c0_i32, %c0_i32_0 : i32, i32
  }
  func.func @transform_8(%arg0: i32, %arg1: i32) -> (i32, i32) {
    %c0_i32 = arith.constant 0 : i32
    %c0_i32_0 = arith.constant 0 : i32
    %c0_i32_1 = arith.constant 0 : i32
    return %c0_i32, %c0_i32_0 : i32, i32
  }
  func.func @transform_9(%arg0: i32, %arg1: i32) -> (i32, i32, i32) {
    %c0_i32 = arith.constant 0 : i32
    %c0_i32_0 = arith.constant 0 : i32
    %c0_i32_1 = arith.constant 0 : i32
    return %arg0, %c0_i32, %c0_i32_0 : i32, i32, i32
  }
}

</mosaic_0001>

<bundles_post_ra>
// kernel: tpu_custom_call.1
= control target key start
LH: loop header
LB: loop body
LE: loop exit
PB: predicated region body
PF: predicated region fallthrough
CT: control target
= control target key end

     0   :  { %s2252_s0 = inlined_call_operand.vmem [shape: f32[2,24,24], index: 0, kind: input, shape index: {}]   ;;  %s2253_s1 = inlined_call_operand.vmem [shape: bf16[4,8,8], index: 1, kind: input, shape index: {}]   ;;  %s2254_s2 = inlined_call_operand.vmem [shape: f32[8,32], index: 2, kind: input, shape index: {}]   ;;  %s2255_s3 = inlined_call_operand.vmem [shape: bf16[64,24], index: 3, kind: input, shape index: {}]   ;;  %s2256_s4 = inlined_call_operand.vmem [shape: f32[64,1], index: 4, kind: input, shape index: {}]   ;;  %s2257_s5 = inlined_call_operand.vmem [shape: bf16[4,8,32], index: 5, kind: input, shape index: {}]   ;;  %s2258_s6 = inlined_call_operand.vmem [shape: f32[1,32], index: 6, kind: input, shape index: {}]   ;;  %s2259_s7 = inlined_call_operand.vmem [shape: f32[1,32], index: 7, kind: input, shape index: {}]   ;;  %s2260_s8 = inlined_call_operand.vmem [shape: f32[1,32], index: 8, kind: input, shape index: {}]   ;;  %s2261_s9 = inlined_call_operand.hbm [shape: f32[2,8,32], index: 9, kind: output, shape index: {}]  }
   0x1   :  { %2264 = sst [smem:[#allocation11_spill]] %s2252_s0 }
   0x2   :  { %14 = vsyncpa [#allocation6], 0 }
   0x3   :  { %16 = vsyncpa [#allocation6 + $0x1], 0  ;;  %s1891_s30 = smov 0   ;;  %s1893_s10 = smov 0  }
   0x4   :  { %s1895_s11 = smov 0   ;;  %s1897_s12 = smov 0  }
   0x5   :  { %s1899_s13 = smov 0   ;;  %s1901_s14 = smov 0  }
   0x6   :  { %s1903_s15 = smov 0   ;;  %s1905_s16 = smov 0  }
   0x7 LB: > { %2265 = sst [smem:[#allocation8_spill]] %s1826_s15  ;;  %s1455_s17 = sadd.s32 4294967295, %s1830_s16   ;;  %s1830_s16 = sphi %s1905_s16, %s22_s16   ;;  %s1826_s15 = sphi %s1903_s15, %s2273_s15   ;;  %s1822_s14 = sphi %s1901_s14, %s2278_s14   ;;  %s1818_s13 = sphi %s1899_s13, %s2271_s13   ;;  %s1814_s12 = sphi %s1897_s12, %s2277_s12   ;;  %s1810_s11 = sphi %s1895_s11, %s2276_s11   ;;  %s1806_s10 = sphi %s1893_s10, %s2275_s10   ;;  %s1802_s30 = sphi %s1891_s30, %s2274_s30  }
   0x8   : > { %s1456_s18 = sadd.s32 4294967294, %s1830_s16   ;;  %s31_s19 = sadd.s32 1, %s1822_s14 }
   0x9   : > { %p32_p0 = scmp.ge.s32.totalorder %s31_s19, 3  ;;  %s34_s20 = sadd.s32 1, %s1826_s15 }
   0xa   : > { %p247_p1 = scmp.ne.s32.totalorder %s1810_s11, %s1806_s10  ;;  %p248_p2 = scmp.eq.s32.totalorder %s1455_s17, 5 }
   0xb   : > { %s2280_s19 = smov (%p32_p0, %s31_s19), 0  ;;  %s2282_s20 = smov (!%p32_p0, %s34_s20), %s1826_s15 }
   0xc   : > { %2266 = sst [smem:[#allocation9_spill]] %s2280_s19  ;;  %p1940_p3 = por %p248_p2, %p247_p1 }
   0xd   : > { %p253_p4 = scmp.ne.s32.totalorder %s1806_s10, %s1802_s30  ;;  %p36_p5 = scmp.ge.s32.totalorder %s2282_s20, 2 }
   0xe   : > { %p254_p6 = scmp.eq.s32.totalorder %s1456_s18, 5  ;;  %p1459_p7 = scmp.ge.s32.totalorder %s1830_s16, 1 }
   0xf   : > { %p307_p8 = scmp.lt.s32.totalorder %s1830_s16, 7  ;;  %s2284_s20 = smov (%p36_p5, %s2282_s20), 0 }
  0x10   : > { %2268 = sst [smem:[#allocation10_spill]] %s2284_s20  ;;  %p1950_p9 = por %p254_p6, %p253_p4 }
  0x11   : > { %p308_p10 = pnand %p1459_p7, %p307_p8  ;;  %s234_s23 = ssub.s32 %s1826_s15, %s2284_s20 }
  0x12   : > { %s237_s24 = sadd.s32 1, %s1810_s11  ;;  %p235_p11 = scmp.eq.s32.totalorder %s234_s23, 0 }
  0x13   : > { %311 = sbr.rel (%p308_p10) target bundleno = 1815 (0x717), region = 56  ;;  %s343_s26 = sand.u32 (!%p308_p10), 1, %s1806_s10  }
  0x14   : > { %s1958_s25 = scalar_select %p235_p11, %s1810_s11, %s237_s24  }
  0x15   : > { %p346_p12 = scmp.lt.s32.totalorder (!%p308_p10), %s1818_s13, 1  ;;  %s1964_s27 = sshll.u32 (!%p308_p10), %s343_s26, 3 }
  0x16   : > { %p348_p13 = scmp.lt.s32.totalorder (!%p308_p10), %s1814_s12, 2  ;;  %s2270_s0 = sld [smem:[#allocation11_spill]] (!%p308_p10) }
  0x17   : > { %s345_s15 = scalar_lea.vmem (!%p308_p10), [#allocation5], %s1964_s27  ;;  %p1462_p0 = scmp.ne.s32.totalorder (!%p308_p10), %s1814_s12, 0 }
  0x1a   : > { %s347_s28 = scalar_select %p346_p12, %s1818_s13, 1 }
  0x1b   : > { %s349_s29 = scalar_select %p348_p13, %s1814_s12, 2 }
  0x1c   : > { %s1620_s17 = smul.u32 3, %s347_s28  ;;  %vm359_vm0 = vcmask (!%p1462_p0), 7168   ;;  %vm368_vm1 = vcmask (!%p1462_p0), 64512   ;;  %v1832_v0 = vmov (!%p1462_p0), -inf   ;;  %v1833_v1 = vmov (!%p1462_p0), 0.0  }
  0x1d   : > { %358 = sbr.rel (%p1462_p0) target bundleno = 36 (0x24), region = 60  ;;  %360 = vst.msk [vmem:[#allocation2] sm:$0xff] (!%p1462_p0), %vm359_vm0, %v1832_v0  ;;  %361 = vst.msk [vmem:[#allocation2 + $0x8] sm:$0xff] (!%p1462_p0), %vm359_vm0, %v1832_v0 }
  0x1e   : > { %s351_s18 = sadd.s32 %s1620_s17, %s349_s29  ;;  %362 = vst.msk [vmem:[#allocation2 + $0x10] sm:$0xff] (!%p1462_p0), %vm359_vm0, %v1832_v0  ;;  %363 = vst.msk [vmem:[#allocation2 + $0x18] sm:$0xff] (!%p1462_p0), %vm359_vm0, %v1832_v0 }
  0x1f   : > { %s1461_s23 = sshll.u32 %s351_s18, 3  ;;  %364 = vst.msk [vmem:[#allocation3] sm:$0xff] (!%p1462_p0), %vm359_vm0, %v1833_v1  ;;  %365 = vst.msk [vmem:[#allocation3 + $0x8] sm:$0xff] (!%p1462_p0), %vm359_vm0, %v1833_v1 }
  0x20   : > { %s353_s19 = scalar_lea.vmem %s2270_s0, %s1461_s23  ;;  %366 = vst.msk [vmem:[#allocation3 + $0x10] sm:$0xff] (!%p1462_p0), %vm359_vm0, %v1833_v1  ;;  %367 = vst.msk [vmem:[#allocation3 + $0x18] sm:$0xff] (!%p1462_p0), %vm359_vm0, %v1833_v1 }
  0x21   : > { %369 = vst.msk [vmem:[#allocation4] sm:$0xff] (!%p1462_p0), %vm368_vm1, %v1833_v1  ;;  %370 = vst.msk [vmem:[#allocation4 + $0x8] sm:$0xff] (!%p1462_p0), %vm368_vm1, %v1833_v1 }
  0x22   : > { %371 = vst.msk [vmem:[#allocation4 + $0x10] sm:$0xff] (!%p1462_p0), %vm368_vm1, %v1833_v1  ;;  %372 = vst.msk [vmem:[#allocation4 + $0x18] sm:$0xff] (!%p1462_p0), %vm368_vm1, %v1833_v1 }
  0x24 PF: > { %v373_v2 = vld [vmem:[%s353_s19] sm:$0xff]  ;;  %vm375_vm2 = vcmask 195584   ;;  %v392_v6 = vld [vmem:[%s2256_s4 + $0x8] sm:$0xff]  ;;  %v1834_v7 = vmov 0   ;;  %v393_v9 = vld [vmem:[%s2256_s4 + $0x10] sm:$0xff]  ;;  %v1835_v18 = vmov 0.0   ;;  %v754_v49 = vlaneseq }
  0x25   : > { %v374_v3 = vmul.f32 %v373_v2, %v373_v2  ;;  %v1702_v5 = vld [vmem:[%s2255_s3] sm:$0xff]   ;;  %1701 = vset.pattern.permute.xlu1 %v1834_v7  ;;  %1700 = vset.pattern.permute.xlu0 %v1834_v7  ;;  %v394_v10 = vld [vmem:[%s2256_s4 + $0x18] sm:$0xff]  ;;  %v1703_v17 = vld [vmem:[%s2255_s3 + $0x8] sm:$0xff]   ;;  %vm1836_vm3 = vmmov 0   ;;  %vm571_vm4 = vcmask 1043456   ;;  %vm567_vm5 = vcmask 64512  }
  0x26   : > { %1539 = vmatprep.mubr.msk.bf16.mxu0 %vm375_vm2, %v1702_v5  ;;  %v391_v8 = vld [vmem:[%s2256_s4] sm:$0xff]  ;;  %406 = vperm.xlu1 %1701, %v392_v6   ;;  %v1704_v19 = vld [vmem:[%s2255_s3 + $0x10] sm:$0xff]   ;;  %v1705_v20 = vld [vmem:[%s2255_s3 + $0x18] sm:$0xff]   ;;  %s1483_s20 = sshll.u32 %s1814_s12, 3  ;;  %v755_v50 = vand.u32 127, %v754_v49  ;;  %vm851_vm7 = vcmask 7168  }
  0x27   : > { %v376_v4 = vsel %vm375_vm2, %v374_v3, 0.0  ;;  %1547 = vmatprep.subr.bf16.mxu1 %v1835_v18  ;;  %1549 = vmatprep.mubr.msk.bf16.mxu1 %vm1836_vm3, %v1835_v18  ;;  %v563_v37 = vld [vmem:[%s2253_s1] sm:$0xf]  ;;  %v566_v38 = vld [vmem:[%s2253_s1 + $0xc] sm:$0xf]  ;;  %v756_v51 = vstv %s1483_s20  ;;  %p1488_p1 = scmp.ne.s32.totalorder %s1814_s12, 2 }
  0x28   : > { %377 = vadd.xlane.f32.xlu0 %v376_v4  ;;  %v564_v42 = vld [vmem:[%s2253_s1 + $0x4] sm:$0xf]  ;;  %v565_v44 = vld [vmem:[%s2253_s1 + $0x8] sm:$0xf]  ;;  %v757_v52 = vadd.s32 %v756_v51, %v755_v50  ;;  %vm1839_vm8 = vmmov (!%p1488_p1), 0   ;;  %vm1316_vm9 = vcmask (!%p1488_p1), 261120  }
  0x2a   : > { %411 = vperm.xlu1 %1701, %v393_v9   ;;  %vm758_vm6 = vcmp.lt.s32.totalorder %v757_v52, 20 }
  0x2e   : > { %416 = vperm.xlu1 %1701, %v394_v10  }
  0x3e   : > { %401 = vperm.xlu0 %1700, %v391_v8  }
  0xa5   : > { %v407_v21 = vpop.permute.xlu1 %406 }
  0xa9   : > { %v412_v22 = vpop.permute.xlu1 %411 }
  0xad   : > { %v417_v25 = vpop.permute.xlu1 %416 }
  0xb5   : > { %v378_v11 = vpop.xlane.xlu0 %377 }
  0xb6   : > { %v379_v12 = vmax.f32 %v378_v11, 1e-24 }
  0xb8   : > { %1706 = vrsqrt.f32 %v379_v12 }
  0xbd   : > { %v402_v23 = vpop.permute.xlu0 %401 }
  0xc2   : > { %v1707_v13 = vpop.eup %1706 }
  0xc3   : > { %v381_v14 = vmul.f32 %v1707_v13, %v373_v2  ;;  %v396_v13 = vld [vmem:[%s2256_s4 + $0x28] sm:$0xff] }
  0xc5   : > { %v382_v15 = vpack.c.bf16 %v381_v14, %v381_v14  ;;  %v395_v14 = vld [vmem:[%s2256_s4 + $0x20] sm:$0xff] }
  0xc7   : > { %1619 = vmatprep.subr.msk.bf16.mxu0 %vm375_vm2, %v382_v15  ;;  %v472_v16 = vsel %vm375_vm2, %v382_v15, 0  ;;  %v763_v15 = vld [vmem:[#allocation2] sm:$0xff] }
  0xc8   : > { %1538 = vmatpush3.bf16.xpose.msra.mxu0 %v472_v16 }
  0xc9   : > { %1565 = vmatprep.subr.bf16.mxu0 %v1835_v18 }
  0xcf   : > { %1540 = vmatmul.mubr.msk.bf16.vlgmr.msra.gmra.mrb[0].mxu0 %vm375_vm2, %v1703_v17 }
  0xd0   : > { %1543 = vmatprep.mubr.msk.bf16.mxu0 %vm375_vm2, %v1704_v19 }
  0xd7   : > { %1544 = vmatmul.mubr.msk.bf16.gmra.mrb[4].mxu0 %vm375_vm2, %v1705_v20 }
  0xd8   : > { %1567 = vmatprep.mubr.msk.bf16.mxu0 %vm1836_vm3, %v1835_v18 }
 0x1a2   : > { %v1541_v24 = vpop.f32.mrb[0].mxu0 }
 0x1a3   : > { %v508_v26 = vpop.f32.mrb[1].mxu0  ;;  %v517_v39 = vadd.f32 %v1541_v24, %v412_v22  ;;  %v2078_v24 = vld [vmem:[#allocation2 + $0x10] sm:$0xff] }
 0x1a4   : > { %v509_v27 = vadd.f32 %v508_v26, %v402_v23  ;;  %v1542_v28 = vpop.f32.mrb[2].mxu0 }
 0x1a5   : > { %v520_v29 = vadd.f32 %v1542_v28, %v417_v25  ;;  %v511_v30 = vpop.f32.mrb[3].mxu0  ;;  %v1502_v41 = vpack.c.bf16 %v517_v39, %v517_v39 }
 0x1a6   : > { %v1500_v31 = vpack.c.bf16 %v509_v27, %v509_v27  ;;  %v512_v32 = vadd.f32 %v511_v30, %v407_v21  ;;  %v764_v21 = vld [vmem:[#allocation2 + $0x8] sm:$0xff]  ;;  %v2086_v30 = vld [vmem:[#allocation2 + $0x18] sm:$0xff] }
 0x1a7   : > { %v1503_v33 = vpack.c.bf16 %v520_v29, %v520_v29  ;;  %v665_v43 = vsel %vm571_vm4, %v1502_v41, 0 }
 0x1a8   : > { %v1501_v34 = vpack.c.bf16 %v512_v32, %v512_v32  ;;  %v573_v35 = vsel %vm571_vm4, %v1500_v31, 0 }
 0x1a9   : > { %v711_v36 = vsel %vm571_vm4, %v1503_v33, 0  ;;  %1548 = vmatpush3.bf16.msra.mxu1 %v573_v35 }
 0x1aa   : > { %1566 = vmatpush3.bf16.msra.mxu0 %v711_v36  ;;  %1553 = vmatprep.subr.bf16.mxu1 %v1835_v18  ;;  %v619_v40 = vsel %vm571_vm4, %v1501_v34, 0  ;;  %v2043_v45 = vpop.f32.mrb[4].mxu0 }
 0x1ab   : > { %1577 = vmatprep.subr.bf16.mxu0 %v1835_v18  ;;  %v2045_v46 = vpop.f32.mrb[5].mxu0 }
 0x1ac   : > { %1550 = vmatmul.mubr.msk.bf16.vlgmr.msra.gmra.mrb[0].mxu1 %vm567_vm5, %v563_v37  ;;  %v2047_v47 = vpop.f32.mrb[6].mxu0 }
 0x1ad   : > { %1554 = vmatpush3.bf16.msra.mxu1 %v619_v40  ;;  %1555 = vmatprep.mubr.msk.bf16.mxu1 %vm1836_vm3, %v1835_v18  ;;  %v527_v48 = vpop.f32.mrb[7].mxu0 }
 0x1ae   : > { %1559 = vmatprep.subr.bf16.mxu1 %v1835_v18  ;;  %1568 = vmatmul.mubr.msk.bf16.vlgmr.msra.gmra.mrb[8].mxu0 %vm567_vm5, %v566_v38 }
 0x1af   : > { %1579 = vmatprep.mubr.msk.bf16.mxu0 %vm1836_vm3, %v1835_v18 }
 0x1b4   : > { %1556 = vmatmul.mubr.msk.bf16.vlgmr.msra.gmra.mrb[4].mxu1 %vm567_vm5, %v564_v42  ;;  %v397_v42 = vld [vmem:[%s2256_s4 + $0x30] sm:$0xff] }
 0x1b5   : > { %1560 = vmatpush3.bf16.msra.mxu1 %v665_v43  ;;  %1561 = vmatprep.mubr.msk.bf16.mxu1 %vm1836_vm3, %v1835_v18 }
 0x1b6   : > { %1571 = vmatprep.subr.bf16.mxu1 %v1835_v18 }
 0x1bc   : > { %1562 = vmatmul.mubr.msk.bf16.vlgmr.msra.gmra.mrb[8].mxu1 %vm567_vm5, %v565_v44  ;;  %v398_v44 = vld [vmem:[%s2256_s4 + $0x38] sm:$0xff] }
 0x1bd   : > { %1573 = vmatprep.mubr.msk.bf16.mxu1 %vm1836_vm3, %v1835_v18 }
 0x27f   : > { %v609_v53 = vpop.f32.mrb[0].mxu1 }
 0x280   : > { %v2051_v54 = vsel %vm758_vm6, %v609_v53, -1e+30  ;;  %v1551_v55 = vpop.f32.mrb[1].mxu1 }
 0x281   : > { %v612_v56 = vpop.f32.mrb[2].mxu1  ;;  %v767_v57 = vsel %vm567_vm5, %v2051_v54, -inf  ;;  %v747_v58 = vpop.f32.mrb[8].mxu0 }
 0x282   : > { %768 = vmax.xlane.f32.xlu1 %v767_v57  ;;  %v1552_v59 = vpop.f32.mrb[3].mxu1  ;;  %v1569_v60 = vpop.f32.mrb[9].mxu0  ;;  %v2064_v8 = vsel %vm758_vm6, %v747_v58, -1e+30 }
 0x283   : > { %v750_v61 = vpop.f32.mrb[10].mxu0  ;;  %v776_v12 = vsel %vm567_vm5, %v2064_v8, -inf }
 0x284   : > { %v1570_v62 = vpop.f32.mrb[11].mxu0 }
 0x287   : > { %v655_v63 = vpop.f32.mrb[4].mxu1 }
 0x288   : > { %v2056_v0 = vsel %vm758_vm6, %v655_v63, -1e+30  ;;  %v1557_v1 = vpop.f32.mrb[5].mxu1 }
 0x289   : > { %v658_v2 = vpop.f32.mrb[6].mxu1  ;;  %v770_v3 = vsel %vm567_vm5, %v2056_v0, -inf }
 0x28a   : > { %771 = vmax.xlane.f32.xlu0 %v770_v3  ;;  %v1558_v4 = vpop.f32.mrb[7].mxu1 }
 0x28f   : > { %v701_v5 = vpop.f32.mrb[8].mxu1 }
 0x290   : > { %v2061_v6 = vsel %vm758_vm6, %v701_v5, -1e+30  ;;  %v1563_v7 = vpop.f32.mrb[9].mxu1 }
 0x291   : > { %v704_v9 = vpop.f32.mrb[10].mxu1  ;;  %v773_v10 = vsel %vm567_vm5, %v2061_v6, -inf }
 0x292   : > { %774 = vmax.xlane.f32.xlu1 %v773_v10  ;;  %v1564_v11 = vpop.f32.mrb[11].mxu1 }
 0x296   : > { %777 = vmax.xlane.f32.xlu1 %v776_v12 }
 0x2a0   : > { %426 = vperm.xlu0 %1700, %v396_v13  }
 0x2a7   : > { %421 = vperm.xlu1 %1701, %v395_v14  }
 0x30f   : > { %v769_v16 = vpop.xlane.xlu1 %768 }
 0x310   : > { %v779_v17 = vmax.f32 %v763_v15, %v769_v16 }
 0x312   : > { %v783_v19 = vsub.f32 %v763_v15, %v779_v17  ;;  %1080 = vst.msk [vmem:[#allocation2] sm:$0xff] %vm851_vm7, %v779_v17  ;;  %797 = vperm.xlu1 %1701, %v779_v17  }
 0x314   : > { %v787_v20 = vmul.f32 1.442695, %v783_v19  ;;  %v827_v19 = vld [vmem:[#allocation3] sm:$0xff] }
 0x316   : > { %1708 = vpow2.f32 %v787_v20 }
 0x317   : > { %v772_v22 = vpop.xlane.xlu0 %771 }
 0x318   : > { %v780_v23 = vmax.f32 %v764_v21, %v772_v22 }
 0x31a   : > { %1081 = vst.msk [vmem:[#allocation2 + $0x8] sm:$0xff] %vm851_vm7, %v780_v23  ;;  %802 = vperm.xlu1 %1701, %v780_v23   ;;  %v784_v33 = vsub.f32 %v764_v21, %v780_v23 }
 0x31c   : > { %v789_v38 = vmul.f32 1.442695, %v784_v33 }
 0x31e   : > { %1710 = vpow2.f32 %v789_v38 }
 0x31f   : > { %v427_v25 = vpop.permute.xlu0 %426  ;;  %v775_v26 = vpop.xlane.xlu1 %774 }
 0x320   : > { %v2080_v27 = vpop.eup %1708  ;;  %v528_v28 = vadd.f32 %v527_v48, %v427_v25  ;;  %v2083_v29 = vmax.f32 %v2078_v24, %v775_v26 }
 0x321   : > { %1050 = vperm.xlu0 %1700, %v2080_v27   ;;  %v831_v20 = vmul.f32 %v2080_v27, %v827_v19 }
 0x322   : > { %v1505_v31 = vpack.c.bf16 %v528_v28, %v528_v28  ;;  %v785_v32 = vsub.f32 %v2078_v24, %v2083_v29  ;;  %1082 = vst.msk [vmem:[#allocation2 + $0x10] sm:$0xff] %vm851_vm7, %v2083_v29  ;;  %v828_v24 = vld [vmem:[#allocation3 + $0x8] sm:$0xff] }
 0x323   : > { %v778_v34 = vpop.xlane.xlu1 %777 }
 0x324   : > { %v910_v35 = vsel %vm567_vm5, %v1505_v31, 0  ;;  %v2094_v36 = vmax.f32 %v2086_v30, %v778_v34 }
 0x325   : > { %1578 = vmatpush3.bf16.xpose.msra.mxu0 %v910_v35 }
 0x326   : > { %v786_v37 = vsub.f32 %v2086_v30, %v2094_v36  ;;  %1083 = vst.msk [vmem:[#allocation2 + $0x18] sm:$0xff] %vm851_vm7, %v2094_v36  ;;  %812 = vperm.xlu1 %1701, %v2094_v36   ;;  %1589 = vmatprep.subr.bf16.mxu0 %v1835_v18  ;;  %v1044_v36 = vld [vmem:[#allocation4] sm:$0xff] }
 0x327   : > { %v422_v39 = vpop.permute.xlu1 %421 }
 0x328   : > { %v525_v40 = vadd.f32 %v2045_v46, %v422_v39  ;;  %v2112_v46 = vpop.eup %1710  ;;  %v793_v14 = vmul.f32 1.442695, %v786_v37 }
 0x329   : > { %v832_v25 = vmul.f32 %v2112_v46, %v828_v24 }
 0x32a   : > { %v1504_v41 = vpack.c.bf16 %v525_v40, %v525_v40  ;;  %807 = vperm.xlu1 %1701, %v2083_v29   ;;  %v830_v29 = vld [vmem:[#allocation3 + $0x18] sm:$0xff] }
 0x32c   : > { %v864_v43 = vsel %vm567_vm5, %v1504_v41, 0 }
 0x32d   : > { %1572 = vmatpush3.bf16.xpose.msra.mxu1 %v864_v43  ;;  %v1045_v43 = vld [vmem:[#allocation4 + $0x8] sm:$0xff] }
 0x32e   : > { %431 = vperm.xlu1 %1701, %v397_v42   ;;  %1583 = vmatprep.subr.bf16.mxu1 %v1835_v18 }
 0x332   : > { %436 = vperm.xlu1 %1701, %v398_v44  }
 0x336   : > { %1055 = vperm.xlu1 %1701, %v2112_v46  }
 0x391   : > { %v798_v48 = vpop.permute.xlu1 %797 }
 0x392   : > { %v815_v49 = vsub.f32 %v2051_v54, %v798_v48 }
 0x394   : > { %v819_v50 = vmul.f32 1.442695, %v815_v49 }
 0x396   : > { %1712 = vpow2.f32 %v819_v50 }
 0x399   : > { %v803_v51 = vpop.permute.xlu1 %802 }
 0x39a   : > { %v816_v52 = vsub.f32 %v2056_v0, %v803_v51 }
 0x39c   : > { %v821_v53 = vmul.f32 1.442695, %v816_v52  ;;  %v1046_v52 = vld [vmem:[#allocation4 + $0x10] sm:$0xff] }
 0x39e   : > { %1714 = vpow2.f32 %v821_v53 }
 0x3a0   : > { %v1713_v55 = vpop.eup %1712  ;;  %v1051_v23 = vpop.permute.xlu0 %1050 }
 0x3a1   : > { %v835_v56 = vsel %vm567_vm5, %v1713_v55, 0.0  ;;  %v856_v57 = vpack.c.bf16 %v1713_v55, %v1713_v55  ;;  %v1068_v37 = vmul.f32 %v1051_v23, %v1044_v36 }
 0x3a2   : > { %836 = vadd.xlane.f32.xlu1 %v835_v56  ;;  %v1047_v56 = vld [vmem:[#allocation4 + $0x18] sm:$0xff] }
 0x3a3   : > { %1574 = vmatmul.mubr.msk.bf16.vlgmr.msra.gmra.mrb[12].mxu1 %vm567_vm5, %v856_v57 }
 0x3a4   : > { %1585 = vmatprep.mubr.msk.bf16.mxu1 %vm1836_vm3, %v1835_v18 }
 0x3a5   : > { %v813_v58 = vpop.permute.xlu1 %812 }
 0x3a6   : > { %v818_v54 = vsub.f32 %v2064_v8, %v813_v58 }
 0x3a8   : > { %v1715_v59 = vpop.eup %1714  ;;  %v825_v60 = vmul.f32 1.442695, %v818_v54 }
 0x3a9   : > { %v808_v61 = vpop.permute.xlu1 %807  ;;  %v838_v62 = vsel %vm567_vm5, %v1715_v59, 0.0  ;;  %v857_v63 = vpack.c.bf16 %v1715_v59, %v1715_v59 }
 0x3aa   : > { %1716 = vpow2.f32 %v825_v60  ;;  %v817_v0 = vsub.f32 %v2061_v6, %v808_v61  ;;  %839 = vadd.xlane.f32.xlu0 %v838_v62 }
 0x3ab   : > { %1580 = vmatmul.mubr.msk.bf16.vlgmr.msra.gmra.mrb[12].mxu0 %vm567_vm5, %v857_v63 }
 0x3ac   : > { %v823_v1 = vmul.f32 1.442695, %v817_v0  ;;  %1591 = vmatprep.mubr.msk.bf16.mxu0 %vm1836_vm3, %v1835_v18 }
 0x3ad   : > { %v432_v2 = vpop.permute.xlu1 %431 }
 0x3ae   : > { %1718 = vpow2.f32 %v823_v1  ;;  %v533_v3 = vadd.f32 %v2043_v45, %v432_v2  ;;  %v791_v45 = vmul.f32 1.442695, %v785_v32  ;;  %v829_v32 = vld [vmem:[#allocation3 + $0x10] sm:$0xff] }
 0x3b0   : > { %v1506_v4 = vpack.c.bf16 %v533_v3, %v533_v3  ;;  %1720 = vpow2.f32 %v791_v45 }
 0x3b1   : > { %v437_v5 = vpop.permute.xlu1 %436  ;;  %1722 = vpow2.f32 %v793_v14 }
 0x3b2   : > { %v956_v7 = vsel %vm567_vm5, %v1506_v4, 0  ;;  %v536_v8 = vadd.f32 %v2047_v47, %v437_v5 }
 0x3b3   : > { %1584 = vmatpush3.bf16.xpose.msra.mxu1 %v956_v7 }
 0x3b4   : > { %v1717_v9 = vpop.eup %1716  ;;  %v1507_v6 = vpack.c.bf16 %v536_v8, %v536_v8  ;;  %v1837_v8 = vmov (!%p1488_p1), 0  }
 0x3b5   : > { %v844_v10 = vsel %vm567_vm5, %v1717_v9, 0.0  ;;  %v859_v47 = vpack.c.bf16 %v1717_v9, %v1717_v9  ;;  %v1056_v17 = vpop.permute.xlu1 %1055 }
 0x3b6   : > { %v1002_v11 = vsel %vm567_vm5, %v1507_v6, 0  ;;  %845 = vadd.xlane.f32.xlu1 %v844_v10  ;;  %v1069_v44 = vmul.f32 %v1056_v17, %v1045_v43  ;;  %v1128_v10 = vld [vmem:[%s2257_s5] sm:$0xf] (!%p1488_p1)  ;;  %v1130_v17 = vld [vmem:[%s2257_s5 + $0x8] sm:$0xf] (!%p1488_p1) }
 0x3b7   : > { %1590 = vmatpush3.bf16.xpose.msra.mxu0 %v1002_v11  ;;  %v1136_v45 = vsel (!%p1488_p1), %vm571_vm4, %v1128_v10, 0  ;;  %v1228_v24 = vsel (!%p1488_p1), %vm571_vm4, %v1130_v17, 0 }
 0x3b8   : > { %v1719_v18 = vpop.eup %1718 }
 0x3b9   : > { %v841_v12 = vsel %vm567_vm5, %v1719_v18, 0.0  ;;  %v858_v13 = vpack.c.bf16 %v1719_v18, %v1719_v18  ;;  %v1838_v18 = vmov (!%p1488_p1), 0.0  }
 0x3ba   : > { %842 = vadd.xlane.f32.xlu0 %v841_v12  ;;  %v1721_v15 = vpop.eup %1720  ;;  %1595 = vmatprep.subr.bf16.mxu0 (!%p1488_p1), %v1838_v18 }
 0x3bb   : > { %1586 = vmatmul.mubr.msk.bf16.vlgmr.msra.gmra.mrb[16].mxu1 %vm567_vm5, %v858_v13  ;;  %v1723_v16 = vpop.eup %1722  ;;  %v833_v27 = vmul.f32 %v1721_v15, %v829_v32  ;;  %1601 = vmatprep.subr.bf16.mxu1 (!%p1488_p1), %v1838_v18 }
 0x3bc   : > { %v834_v30 = vmul.f32 %v1723_v16, %v830_v29  ;;  %1603 = vmatprep.mubr.msk.bf16.mxu1 (!%p1488_p1), %vm1839_vm8, %v1838_v18 }
 0x3be   : > { %1592 = vmatmul.mubr.msk.bf16.vlgmr.msra.gmra.mrb[16].mxu0 %vm567_vm5, %v859_v47  ;;  %v1129_v47 = vld [vmem:[%s2257_s5 + $0x4] sm:$0xf] (!%p1488_p1) }
 0x3bf   : > { %1596 = vmatpush3.bf16.msra.mxu0 (!%p1488_p1), %v1136_v45  ;;  %1597 = vmatprep.mubr.msk.bf16.mxu0 (!%p1488_p1), %vm1839_vm8, %v1838_v18  ;;  %v1182_v14 = vsel (!%p1488_p1), %vm571_vm4, %v1129_v47, 0  ;;  %v1495_v45 = vld [vmem:[%s2260_s8] ss:$0 sm:$0xff] (!%p1488_p1) }
 0x3c0   : > { %1607 = vmatprep.subr.bf16.mxu0 (!%p1488_p1), %v1838_v18  ;;  %1602 = vmatpush3.bf16.msra.mxu1 (!%p1488_p1), %v1182_v14 }
 0x3c1   : > { %1613 = vmatprep.subr.bf16.mxu1 (!%p1488_p1), %v1838_v18 }
 0x3c7   : > { %1060 = vperm.xlu1 %1701, %v1721_v15  }
 0x3cb   : > { %1725 = vset.pattern.permute.xlu1 (!%p1488_p1), %v1837_v8 }
 0x3d0   : > { %1065 = vperm.xlu0 %1700, %v1723_v16  }
 0x3d4   : > { %1724 = vset.pattern.permute.xlu0 (!%p1488_p1), %v1837_v8 }
 0x42f   : > { %v837_v21 = vpop.xlane.xlu1 %836 }
 0x430   : > { %v847_v22 = vadd.f32 %v837_v21, %v831_v20 }
 0x432   : > { %852 = vst.msk [vmem:[#allocation3] sm:$0xff] %vm851_vm7, %v847_v22 }
 0x437   : > { %v840_v26 = vpop.xlane.xlu0 %839 }
 0x438   : > { %v848_v28 = vadd.f32 %v840_v26, %v832_v25  ;;  %v1131_v26 = vld [vmem:[%s2257_s5 + $0xc] sm:$0xf] (!%p1488_p1) }
 0x439   : > { %v1092_v4 = vld [vmem:[#allocation3] sm:$0xff] (!%p1488_p1) }
 0x43a   : > { %853 = vst.msk [vmem:[#allocation3 + $0x8] sm:$0xff] %vm851_vm7, %v848_v28  ;;  %1726 = vrcp.f32 (!%p1488_p1), %v1092_v4 }
 0x441   : > { %v1093_v7 = vld [vmem:[#allocation3 + $0x8] sm:$0xff] (!%p1488_p1) }
 0x443   : > { %v846_v31 = vpop.xlane.xlu1 %845 }
 0x444   : > { %v850_v33 = vadd.f32 %v846_v31, %v834_v30  ;;  %v1727_v6 = vpop.eup (!%p1488_p1), %1726  ;;  %v1274_v31 = vsel (!%p1488_p1), %vm571_vm4, %v1131_v26, 0 }
 0x445   : > { %1102 = vperm.xlu0 (!%p1488_p1), %1724, %v1727_v6  }
 0x446   : > { %855 = vst.msk [vmem:[#allocation3 + $0x18] sm:$0xff] %vm851_vm7, %v850_v33 }
 0x447   : > { %v843_v34 = vpop.xlane.xlu0 %842  ;;  %v1061_v53 = vpop.permute.xlu1 %1060 }
 0x448   : > { %v849_v35 = vadd.f32 %v843_v34, %v833_v27  ;;  %v1070_v55 = vmul.f32 %v1061_v53, %v1046_v52 }
 0x44a   : > { %854 = vst.msk [vmem:[#allocation3 + $0x10] sm:$0xff] %vm851_vm7, %v849_v35 }
 0x44d   : > { %v1095_v9 = vld [vmem:[#allocation3 + $0x18] sm:$0xff] (!%p1488_p1) }
 0x44f   : > { %v1066_v57 = vpop.permute.xlu0 %1065 }
 0x450   : > { %v1071_v60 = vmul.f32 %v1066_v57, %v1047_v56 }
 0x451   : > { %v1094_v5 = vld [vmem:[#allocation3 + $0x10] sm:$0xff] (!%p1488_p1) }
 0x452   : > { %1728 = vrcp.f32 (!%p1488_p1), %v1094_v5 }
 0x453   : > { %1730 = vrcp.f32 (!%p1488_p1), %v1093_v7 }
 0x454   : > { %1732 = vrcp.f32 (!%p1488_p1), %v1095_v9 }
 0x45c   : > { %v1729_v11 = vpop.eup (!%p1488_p1), %1728 }
 0x45d   : > { %v1731_v12 = vpop.eup (!%p1488_p1), %1730  ;;  %1112 = vperm.xlu1 (!%p1488_p1), %1725, %v1729_v11   ;;  %v1494_v11 = vld [vmem:[%s2259_s7] ss:$0 sm:$0xff] (!%p1488_p1) }
 0x45e   : > { %v1733_v13 = vpop.eup (!%p1488_p1), %1732  ;;  %1107 = vperm.xlu0 (!%p1488_p1), %1724, %v1731_v12  }
 0x461   : > { %1117 = vperm.xlu1 (!%p1488_p1), %1725, %v1733_v13  }
 0x476   : > { %v900_v38 = vpop.f32.mrb[12].mxu1 }
 0x477   : > { %v1072_v39 = vadd.f32 %v1068_v37, %v900_v38  ;;  %v1575_v40 = vpop.f32.mrb[13].mxu1 }
 0x478   : > { %v903_v41 = vpop.f32.mrb[14].mxu1 }
 0x479   : > { %1076 = vst.msk [vmem:[#allocation4] sm:$0xff] %vm567_vm5, %v1072_v39  ;;  %v1576_v42 = vpop.f32.mrb[15].mxu1 }
 0x47e   : > { %v946_v46 = vpop.f32.mrb[12].mxu0 }
 0x47f   : > { %v1073_v48 = vadd.f32 %v1069_v44, %v946_v46  ;;  %v1581_v49 = vpop.f32.mrb[13].mxu0 }
 0x480   : > { %v949_v50 = vpop.f32.mrb[14].mxu0  ;;  %v1088_v15 = vld [vmem:[#allocation4] sm:$0xff] (!%p1488_p1) }
 0x481   : > { %1077 = vst.msk [vmem:[#allocation4 + $0x8] sm:$0xff] %vm567_vm5, %v1073_v48  ;;  %v1582_v51 = vpop.f32.mrb[15].mxu0 }
 0x488   : > { %v1089_v22 = vld [vmem:[#allocation4 + $0x8] sm:$0xff] (!%p1488_p1) }
 0x48e   : > { %v992_v58 = vpop.f32.mrb[16].mxu1  ;;  %1087 = sbr.rel (%p1488_p1) target bundleno = 1791 (0x6ff), region = 64 }
 0x48f   : > { %v1074_v54 = vadd.f32 %v1070_v55, %v992_v58  ;;  %v1587_v59 = vpop.f32.mrb[17].mxu1  ;;  %v1493_v58 = vld [vmem:[%s2258_s6] ss:$0 sm:$0xff] (!%p1488_p1) }
 0x490   : > { %v995_v61 = vpop.f32.mrb[18].mxu1 }
 0x491   : > { %1078 = vst.msk [vmem:[#allocation4 + $0x10] sm:$0xff] %vm567_vm5, %v1074_v54  ;;  %v1588_v62 = vpop.f32.mrb[19].mxu1  ;;  %v1038_v63 = vpop.f32.mrb[16].mxu0 }
 0x492   : > { %v1075_v0 = vadd.f32 %v1071_v60, %v1038_v63  ;;  %v1593_v1 = vpop.f32.mrb[17].mxu0  ;;  %v1332_v62 = vld [vmem:[%s2254_s2] sm:$0xff] (!%p1488_p1) }
 0x493   : > { %v1041_v2 = vpop.f32.mrb[18].mxu0 }
 0x494   : > { %1079 = vst.msk [vmem:[#allocation4 + $0x18] sm:$0xff] %vm567_vm5, %v1075_v0  ;;  %v1594_v3 = vpop.f32.mrb[19].mxu0 }
 0x498   : > { %v1090_v21 = vld [vmem:[#allocation4 + $0x10] sm:$0xff] }
 0x49b   : > { %v1091_v33 = vld [vmem:[#allocation4 + $0x18] sm:$0xff] }
 0x4c4   : > { %v1103_v16 = vpop.permute.xlu0 %1102 }
 0x4c5   : > { %v1120_v19 = vmul.f32 %v1103_v16, %v1088_v15 }
 0x4c7   : > { %v1124_v23 = vpack.c.bf16 %v1120_v19, %v1120_v19 }
 0x4c9   : > { %1598 = vmatmul.mubr.msk.bf16.vlgmr.msra.gmra.mrb[0].mxu0 %vm567_vm5, %v1124_v23 }
 0x4ca   : > { %1608 = vmatpush3.bf16.msra.mxu0 %v1228_v24  ;;  %1609 = vmatprep.mubr.msk.bf16.mxu0 %vm1839_vm8, %v1838_v18 }
 0x4dc   : > { %v1113_v20 = vpop.permute.xlu1 %1112 }
 0x4dd   : > { %v1108_v25 = vpop.permute.xlu0 %1107  ;;  %v1122_v28 = vmul.f32 %v1113_v20, %v1090_v21 }
 0x4de   : > { %v1121_v29 = vmul.f32 %v1108_v25, %v1089_v22 }
 0x4df   : > { %v1126_v27 = vpack.c.bf16 %v1122_v28, %v1122_v28 }
 0x4e0   : > { %v1125_v30 = vpack.c.bf16 %v1121_v29, %v1121_v29  ;;  %v1118_v32 = vpop.permute.xlu1 %1117 }
 0x4e1   : > { %v1123_v34 = vmul.f32 %v1118_v32, %v1091_v33  ;;  %1610 = vmatmul.mubr.msk.bf16.vlgmr.msra.gmra.mrb[4].mxu0 %vm567_vm5, %v1126_v27 }
 0x4e2   : > { %1604 = vmatmul.mubr.msk.bf16.vlgmr.msra.gmra.mrb[0].mxu1 %vm567_vm5, %v1125_v30 }
 0x4e3   : > { %1614 = vmatpush3.bf16.msra.mxu1 %v1274_v31  ;;  %1615 = vmatprep.mubr.msk.bf16.mxu1 %vm1839_vm8, %v1838_v18  ;;  %v1127_v35 = vpack.c.bf16 %v1123_v34, %v1123_v34 }
 0x4ea   : > { %1616 = vmatmul.mubr.msk.bf16.vlgmr.msra.gmra.mrb[4].mxu1 %vm567_vm5, %v1127_v35 }
 0x59c   : > { %v1172_v36 = vpop.f32.mrb[0].mxu0 }
 0x59d   : > { %v1599_v37 = vpop.f32.mrb[1].mxu0  ;;  %v1317_v41 = vsel %vm1316_vm9, %v1172_v36, 0.0 }
 0x59e   : > { %v1175_v38 = vpop.f32.mrb[2].mxu0 }
 0x59f   : > { %v1600_v39 = vpop.f32.mrb[3].mxu0 }
 0x5b4   : > { %v1264_v49 = vpop.f32.mrb[4].mxu0 }
 0x5b5   : > { %v1218_v40 = vpop.f32.mrb[0].mxu1  ;;  %v1320_v50 = vsel %vm1316_vm9, %v1264_v49, 0.0  ;;  %v1611_v51 = vpop.f32.mrb[5].mxu0 }
 0x5b6   : > { %v1318_v42 = vsel %vm1316_vm9, %v1218_v40, 0.0  ;;  %v1605_v43 = vpop.f32.mrb[1].mxu1  ;;  %v1267_v53 = vpop.f32.mrb[6].mxu0 }
 0x5b7   : > { %v1319_v44 = vadd.f32 %v1318_v42, %v1317_v41  ;;  %v1221_v46 = vpop.f32.mrb[2].mxu1  ;;  %v1612_v55 = vpop.f32.mrb[7].mxu0 }
 0x5b8   : > { %v1606_v48 = vpop.f32.mrb[3].mxu1 }
 0x5b9   : > { %v1321_v52 = vadd.f32 %v1320_v50, %v1319_v44 }
 0x5bd   : > { %v1310_v56 = vpop.f32.mrb[4].mxu1 }
 0x5be   : > { %v1322_v57 = vsel %vm1316_vm9, %v1310_v56, 0.0  ;;  %v1617_v54 = vpop.f32.mrb[5].mxu1 }
 0x5bf   : > { %v1323_v59 = vadd.f32 %v1322_v57, %v1321_v52  ;;  %v1313_v60 = vpop.f32.mrb[6].mxu1 }
 0x5c0   : > { %v1618_v61 = vpop.f32.mrb[7].mxu1 }
 0x5c1   : > { %v1331_v63 = vadd.f32 %v1493_v58, %v1323_v59 }
 0x5c3   : > { %v1333_v0 = vadd.f32 %v1332_v62, %v1331_v63 }
 0x5c5   : > { %v1334_v1 = vsel %vm1316_vm9, %v1333_v0, 0.0 }
 0x5c6   : > { %1335 = vadd.xlane.f32.xlu0 %v1334_v1 }
 0x653   : > { %v1336_v2 = vpop.xlane.xlu0 %1335 }
 0x654   : > { %v1338_v3 = vmul.f32 0.03125, %v1336_v2 }
 0x656   : > { %v1339_v4 = vsub.f32 %v1333_v0, %v1338_v3 }
 0x658   : > { %v1340_v5 = vmul.f32 %v1339_v4, %v1339_v4 }
 0x65a   : > { %v1341_v7 = vsel %vm1316_vm9, %v1340_v5, 0.0 }
 0x65b   : > { %1342 = vadd.xlane.f32.xlu1 %v1341_v7 }
 0x6e8   : > { %v1343_v8 = vpop.xlane.xlu1 %1342 }
 0x6e9   : > { %v1344_v9 = vmul.f32 0.03125, %v1343_v8 }
 0x6eb   : > { %v1345_v6 = vadd.f32 1e-05, %v1344_v9 }
 0x6ed   : > { %1734 = vrsqrt.f32 %v1345_v6 }
 0x6f7   : > { %v1735_v10 = vpop.eup %1734 }
 0x6f8   : > { %v1347_v18 = vmul.f32 %v1735_v10, %v1339_v4 }
 0x6fa   : > { %v1355_v12 = vmul.f32 %v1494_v11, %v1347_v18 }
 0x6fc   : > { %v1363_v13 = vadd.f32 %v1495_v45, %v1355_v12 }
 0x6fe   : > { %1364 = vst.msk [vmem:[%s345_s15] sm:$0xff] %vm1316_vm9, %v1363_v13 }
 0x6ff PF: > { %s1497_s24 = sshll.u32 %s1818_s13, 7  ;;  %s1379_s12 = sshll.u32 %s345_s15, 4  ;;  %s1380_s12 = int_to_ptr.vmem [resolvable:$true] %s1379_s12 }
 0x700   : > { %s2201_s29 = scalar_lea.hbm %s2261_s9, %s1497_s24  ;;  %s1366_s17 = scalar_lea.sflag [#allocation6], %s343_s26 }
 0x701   : > { %s1736_s18 = scalar_lea.vmem %s1380_s12, 128  ;;  %s1840_s19 = smov [#allocation5]  }
 0x702   : > { %p1737_p2 = scmp.ne.s32.totalorder %s1380_s12, %s1736_s18  ;;  %s1740_s23 = sshll.u32 %s1840_s19, 4  ;;  %s1741_s23 = int_to_ptr.vmem [resolvable:$false] %s1740_s23 }
 0x703   : > { %s1742_s0 = scalar_lea.vmem %s1741_s23, 256  ;;  %p1743_p6 = scmp.lt.s32.totalorder %s1380_s12, %s1741_s23 }
 0x704   : > { %p1738_p4 = pnand %p1737_p2, %p1940_p3  ;;  %p1744_p7 = scmp.lt.s32.totalorder %s1742_s0, %s1736_s18 }
 0x706   : > { %p1739_p5 = pneg %p1738_p4  ;;  %p1745_p8 = por %p1744_p7, %p1743_p6 }
 0x708   : > { %p1746_p10 = pnand %p1745_p8, %p1739_p5 }
 0x70a   : > { %1749 = shalt.err (!%p1746_p10)
}
 0x70b   : > { %s1750_s13 = scalar_lea.hbm %s2201_s29, 128  ;;  %s1754_s27 = scalar_lea.hbm %s2261_s9, 256 }
 0x70c   : > { %p1751_p11 = scmp.ne.s32.totalorder %s2201_s29, %s1750_s13  ;;  %p1755_p0 = scmp.lt.u32.totalorder %s2201_s29, %s2261_s9 }
 0x70d   : > { %p1756_p1 = scmp.lt.u32.totalorder %s1754_s27, %s1750_s13  ;;  %p1758_p4 = scmp.lt.u32.totalorder %s1750_s13, %s2201_s29 }
 0x70e   : > { %p1752_p12 = pnand %p1751_p11, %p1940_p3 }
 0x70f   : > { %p1757_p2 = por %p1756_p1, %p1755_p0 }
 0x710   : > { %p1753_p13 = pneg %p1752_p12 }
 0x711   : > { %p1759_p5 = por %p1758_p4, %p1757_p2 }
 0x713   : > { %p1760_p6 = pnand %p1759_p5, %p1753_p13 }
 0x715   : > { %1763 = shalt.err (!%p1760_p6)
}
 0x716   : > { %1621 = dma.vmem_to_hbm [thread:$0]  (%p1940_p3), %s1380_s12, 128, %s2201_s29, %s1366_s17  }
 0x717 PF: > { %p1627_p7 = scmp.ge.s32.totalorder %s1830_s16, 2  ;;  %s1391_s0 = sand.u32 1, %s1802_s30  }
 0x718   : > { %s1392_s28 = scalar_lea.sflag [#allocation6], %s1391_s0 }
 0x719   : > { %p1624_p8 = pnand %p1627_p7, %p1950_p9 }
 0x71b   : > { %1797 = dma.done.wait (!%p1624_p8), %s1392_s28, 128  }
 0x71c   : > { %1799 = vsyncadd (!%p1624_p8), %s1392_s28, 4294967168  ;;  %s22_s16 = sadd.s32 1, %s1830_s16   ;;  %s2271_s13 = sld [smem:[#allocation8_spill]] }
 0x71d   : > { %p19_p10 = scmp.ge.s32.totalorder %s22_s16, 8   ;;  %s2272_s21 = sld [smem:[#allocation9_spill]] }
 0x71e   : > { %s2273_s15 = sld [smem:[#allocation10_spill]]  ;;  %s2274_s30 = smov %s1806_s10 }
 0x71f   : > { %s2275_s10 = smov %s1810_s11  ;;  %s2276_s11 = smov %s1958_s25 }
 0x720   : > { %s2277_s12 = smov %s1822_s14  ;;  %21 = sbr.rel (!%p19_p10) target bundleno = 7 (0x7), region = 99 }
 0x723   : > { %s2278_s14 = smov %s2272_s21 }
 0x727   :  { %1397 = vsyncpa [#allocation6], 1 }
 0x728   :  { %1399 = vsyncpa [#allocation6 + $0x1], 1 }

</bundles_post_ra>
